<compile_context>
chip_gen: v5e
topology: v5e:2x2
jax: 0.10.0
libtpu: 0.0.40
codegen_flags: <defaults>
</compile_context>

<pallas_src>
import functools

import jax
import jax.numpy as jnp
from jax import lax
from jax.experimental import pallas as pl
from jax.experimental.pallas import tpu as pltpu

EPSILON = 1e-06


def _focal_weight(q, gamma):
    """(1 - p) ** gamma, with small integer gammas lowered to a multiply chain."""
    g = float(gamma)
    if g.is_integer() and 0 <= g <= 8:
        gi = int(g)
        if gi == 0:
            return jnp.ones_like(q)
        r = q
        for _ in range(gi - 1):
            r = r * q
        return r
    return q ** g  # non-integer gamma: pow fallback (EUP exp/log)


def _focal_loss_kernel(x_ref, t_ref, o_ref, *, gamma, n, hw, nb, tl,
                       num_tiles, tiles_per_split, splits, from_labels):
    b = pl.program_id(0)   # batch-block index      ("parallel")
    s = pl.program_id(1)   # spatial split           ("parallel" -> 2nd TC on v7x)
    j = pl.program_id(2)   # tile within the split   ("arbitrary" reduction axis)

    # Per-(batch-block, split) partial sum lives in the resident (1, 1) output
    # block across the spatial reduction axis.
    @pl.when(j == 0)
    def _():
        o_ref[...] = jnp.zeros_like(o_ref)

    x = x_ref[...].astype(jnp.float32)            # (nb, C, TL), class on sublanes
    m = jnp.max(x, axis=1, keepdims=True)         # (nb, 1, TL)
    sft = x - m
    e = jnp.exp(sft)
    sumexp = jnp.sum(e, axis=1, keepdims=True)    # (nb, 1, TL)
    log_p = sft - jnp.log(sumexp)                 # log_softmax(output, dim=1)
    p = jnp.exp(log_p)                            # softmax via EUP exp (exact; no approx recip)
    p = jnp.clip(p, EPSILON, 1.0 - EPSILON)       # torch.clamp(p, eps, 1 - eps)
    lw = log_p * _focal_weight(1.0 - p, gamma)    # (nb, C, TL); negated once in the wrapper

    if from_labels:
        # Synthesize the one-hot target from an int32 label map: ~C x fewer
        # target bytes from HBM; the compare is free VALU filler when mem-bound.
        cls = lax.broadcasted_iota(jnp.int32, lw.shape, 1)
        contrib = jnp.where(cls == t_ref[...], lw, 0.0)
    else:
        contrib = t_ref[...].astype(jnp.float32) * lw

    col = jnp.sum(contrib, axis=1, keepdims=True)  # (nb, 1, TL) per-pixel (+)loss

    tile = s * tiles_per_split + j                 # global spatial-tile index

    def _accum(v):
        red = jnp.sum(v, axis=0)                               # (rows, 1, TL) -> (1, TL)
        o_ref[...] += jnp.sum(red, axis=1, keepdims=True)      # (1, 1)

    first_partial = hw // tl
    spatial_ragged = (hw % tl != 0) or (splits * tiles_per_split > num_tiles)

    def _finish(v):
        if not spatial_ragged:
            _accum(v)
            return

        # Only edge tiles pay the iota/compare/select; interior tiles skip it.
        is_edge = tile >= first_partial

        @pl.when(jnp.logical_not(is_edge))
        def _():
            _accum(v)

        @pl.when(is_edge)
        def _():
            lane = lax.broadcasted_iota(jnp.int32, v.shape, 2)
            # Select (not multiply) so NaN/Inf from padded lanes is discarded.
            _accum(jnp.where(lane + tile * tl < hw, v, 0.0))

    nbb = (n + nb - 1) // nb
    if n % nb == 0:
        _finish(col)
    else:
        # Ragged last batch block: number of valid rows is static, so slice them.
        last_valid = n - (nbb - 1) * nb

        @pl.when(b < nbb - 1)
        def _():
            _finish(col)

        @pl.when(b == nbb - 1)
        def _():
            _finish(col[:last_valid])


def _chip_defaults():
    """(per-input block bytes, vmem_limit_bytes) tuned per TPU generation."""
    kind = ""
    try:
        kind = jax.devices()[0].device_kind.lower()
    except Exception:
        pass
    if "v7" in kind or "tpu7" in kind:
        # 64 MiB physical VMEM: 2 in x 2 buf x 6 MiB + f32 temps leaves headroom vs 48 MiB.
        return 6 * 1024 * 1024, 48 << 20
    if "v6" in kind:
        # 128 MiB physical: larger blocks amortize the ~0.35 us/step grid overhead.
        return 5 * 1024 * 1024, 64 << 20
    if "v5" in kind:
        # v5e default scoped VMEM is only 16 MiB: keep blocks modest, raise the cap a bit.
        return 2 * 1024 * 1024, 32 << 20
    return 2 * 1024 * 1024, None  # unknown chip: fit the default scoped VMEM


def _plan_tiles(n, c, hw, itemsize, block_bytes):
    """Pick (nb, tl) so each logits block is ~block_bytes and lane-dense."""
    max_tl = max(128, (block_bytes // max(1, c * itemsize)) // 128 * 128)
    if hw > max_tl:
        tl, nb = max_tl, 1                                   # spatial tiling
    else:
        tl = hw                                              # whole image per block
        nb = min(n, max(1, block_bytes // max(1, c * hw * itemsize)))  # batch-block
    num_tiles = -(-hw // tl)
    splits = 2 if num_tiles >= 2 else 1                      # feed both v7x TCs at N=1
    tiles_per_split = -(-num_tiles // splits)
    nbb = -(-n // nb)
    return nb, tl, nbb, num_tiles, splits, tiles_per_split


def _focal_loss_call(x3, t3, *, from_labels, gamma, block_bytes, vmem_limit):
    n, c, hw = x3.shape
    x_item = jnp.dtype(x3.dtype).itemsize
    t_item = jnp.dtype(t3.dtype).itemsize
    itemsize = x_item if from_labels else max(x_item, t_item)

    nb, tl, nbb, num_tiles, splits, tiles_per_split = _plan_tiles(
        n, c, hw, itemsize, block_bytes)
    total_tiles = splits * tiles_per_split

    def idx_map(b, s, j):
        t = s * tiles_per_split + j
        if total_tiles > num_tiles:           # clamp fully-virtual tiles (masked in-kernel)
            t = jnp.minimum(t, num_tiles - 1)
        return (b, 0, t)

    t_block = (nb, 1, tl) if from_labels else (nb, c, tl)

    kernel = functools.partial(
        _focal_loss_kernel, gamma=float(gamma), n=n, hw=hw, nb=nb, tl=tl,
        num_tiles=num_tiles, tiles_per_split=tiles_per_split, splits=splits,
        from_labels=from_labels)

    t_bytes = n * hw * 4 if from_labels else n * c * hw * t_item
    cost = pl.CostEstimate(
        flops=12 * n * c * hw,
        transcendentals=n * hw * (2 * c + 1),      # two exps / elem + log / pixel
        bytes_accessed=n * c * hw * x_item + t_bytes + nbb * splits * 4)

    cp_kwargs = dict(dimension_semantics=("parallel", "parallel", "arbitrary"))
    if vmem_limit is not None:
        cp_kwargs["vmem_limit_bytes"] = int(vmem_limit)

    out = pl.pallas_call(
        kernel,
        out_shape=jax.ShapeDtypeStruct((nbb, splits, 1), jnp.float32),
        grid_spec=pltpu.PrefetchScalarGridSpec(
            num_scalar_prefetch=0,
            grid=(nbb, splits, tiles_per_split),
            in_specs=[
                pl.BlockSpec((nb, c, tl), idx_map),
                pl.BlockSpec(t_block, idx_map),
            ],
            out_specs=pl.BlockSpec((None, 1, 1), lambda b, s, j: (b, s, 0)),
        ),
        compiler_params=pltpu.CompilerParams(**cp_kwargs),
        cost_estimate=cost,
    )(x3, t3)

    # Kernel accumulates +t*log_p*(1-p)^g; negate once here (one less VPU op/elem).
    return -jnp.sum(out) / jnp.float32(n * hw)


def focal_loss(output, target, gamma=2.0, block_bytes=None, target_dtype=None):
    """Dense-target path. output, target: NCHW arrays of identical shape.

    target_dtype: optional narrowing cast applied to the target before the call
    (bf16 is exact for one-hot targets and cuts target HBM bytes in half).
    """
    assert output.shape == target.shape and output.ndim == 4
    n, c, h, w = output.shape
    hw = h * w
    x3 = output.reshape(n, c, hw)           # NCHW -> [N, C, H*W]: no-copy view
    t3 = target.reshape(n, c, hw)
    if target_dtype is not None:
        t3 = t3.astype(target_dtype)
    default_bb, vmem_limit = _chip_defaults()
    bb = default_bb if block_bytes is None else int(block_bytes)
    return _focal_loss_call(x3, t3, from_labels=False, gamma=gamma,
                            block_bytes=bb, vmem_limit=vmem_limit)


def focal_loss_from_labels(output, labels, gamma=2.0, block_bytes=None):
    """Label-map path (equivalent to a one-hot target over dim=1, much less HBM).

    output: [N, C, H, W] logits; labels: int [N, H, W] (or [N, H*W]) class ids.
    """
    assert output.ndim == 4
    n, c, h, w = output.shape
    hw = h * w
    assert labels.shape in ((n, h, w), (n, hw))
    x3 = output.reshape(n, c, hw)
    l3 = labels.reshape(n, 1, hw).astype(jnp.int32)
    default_bb, vmem_limit = _chip_defaults()
    bb = default_bb if block_bytes is None else int(block_bytes)
    return _focal_loss_call(x3, l3, from_labels=True, gamma=gamma,
                            block_bytes=bb, vmem_limit=vmem_limit)


def focal_loss_reference(output, target, gamma=2.0):
    """Pure-JAX reference mirroring the PyTorch module (NCHW, softmax over dim=1)."""
    p = jax.nn.softmax(output, axis=1)
    p = jnp.clip(p, EPSILON, 1.0 - EPSILON)
    log_p = jax.nn.log_softmax(output, axis=1)
    loss_sce = -target * log_p
    loss_focal = jnp.sum(loss_sce * (1.0 - p) ** gamma, axis=1)
    return jnp.mean(loss_focal)


if __name__ == "__main__":
    key = jax.random.PRNGKey(0)
    k1, k2, k3, k4, k5, k6 = jax.random.split(key, 6)

    # --- Test 1: main demo shape (one batch-blocked grid step), dense + labels.
    N, C, H, W = 2, 4, 16, 16
    logits = jax.random.normal(k1, (N, C, H, W), dtype=jnp.float32)
    labels = jax.random.randint(k2, (N, H, W), 0, C)
    target = jnp.transpose(jax.nn.one_hot(labels, C, dtype=jnp.float32), (0, 3, 1, 2))

    ref1 = focal_loss_reference(logits, target, gamma=2.0)
    loss_dense = jax.block_until_ready(focal_loss(logits, target, gamma=2.0))
    loss_lbl = jax.block_until_ready(focal_loss_from_labels(logits, labels, gamma=2.0))
    assert jnp.allclose(loss_dense, ref1, rtol=1e-4, atol=1e-6), (loss_dense, ref1)
    assert jnp.allclose(loss_lbl, ref1, rtol=1e-4, atol=1e-6), (loss_lbl, ref1)

    # --- Test 2: forced tiny blocks -> spatial tiling + 2-way split + ragged last
    # tile, with a general (soft, non-one-hot) dense target.
    N2, C2, H2, W2 = 3, 5, 20, 20
    logits2 = jax.random.normal(k3, (N2, C2, H2, W2), dtype=jnp.float32)
    target2 = jax.random.uniform(k4, (N2, C2, H2, W2), dtype=jnp.float32)
    ref2 = focal_loss_reference(logits2, target2, gamma=2.0)
    loss2 = jax.block_until_ready(focal_loss(logits2, target2, gamma=2.0,
                                             block_bytes=4096))
    assert jnp.allclose(loss2, ref2, rtol=1e-4, atol=1e-6), (loss2, ref2)

    # --- Test 3: forced tiny blocks -> batch blocking with a ragged last batch
    # block, label-map path.
    N3, C3, H3, W3 = 3, 4, 8, 8
    logits3 = jax.random.normal(k5, (N3, C3, H3, W3), dtype=jnp.float32)
    labels3 = jax.random.randint(k6, (N3, H3, W3), 0, C3)
    target3 = jnp.transpose(jax.nn.one_hot(labels3, C3, dtype=jnp.float32), (0, 3, 1, 2))
    ref3 = focal_loss_reference(logits3, target3, gamma=2.0)
    loss3 = jax.block_until_ready(focal_loss_from_labels(logits3, labels3, gamma=2.0,
                                                         block_bytes=2048))
    assert jnp.allclose(loss3, ref3, rtol=1e-4, atol=1e-6), (loss3, ref3)

    print("KERNEL_OK")
</pallas_src>

<mosaic_0001>
module attributes {stable_mosaic.version = 11 : i64} {
  func.func @_focal_loss_kernel(%arg0: i32, %arg1: i32, %arg2: i32, %arg3: memref<2x4x256xf32, #tpu.memory_space<vmem>>, %arg4: memref<2x4x256xf32, #tpu.memory_space<vmem>>, %arg5: memref<1x1x1xf32, #tpu.memory_space<vmem>>) attributes {dimension_semantics = [#tpu.dimension_semantics<parallel>, #tpu.dimension_semantics<parallel>, #tpu.dimension_semantics<arbitrary>], iteration_bounds = array<i64: 1, 1, 1>, scalar_prefetch = 0 : i64, scratch_operands = 0 : i64, tpu.core_type = #tpu.core_type<tc>, window_params = [{transform_indices = @transform_0, window_bounds = array<i64: 2, 4, 256>}, {transform_indices = @transform_1, window_bounds = array<i64: 2, 4, 256>}, {transform_indices = @transform_2, window_bounds = array<i64: 1, 1, 1>}]} {
    %c0_i32 = arith.constant 0 : i32
    %0 = arith.cmpi eq, %arg2, %c0_i32 : i32
    %1 = arith.extui %0 : i1 to i32
    %c0_i32_0 = arith.constant 0 : i32
    %2 = arith.cmpi ne, %1, %c0_i32_0 : i32
    scf.if %2 {
      %cst_19 = arith.constant 0.000000e+00 : f32
      %36 = vector.broadcast %cst_19 : f32 to vector<1x1xf32>
      %c0_20 = arith.constant 0 : index
      %c0_21 = arith.constant 0 : index
      %c0_22 = arith.constant 0 : index
      %37 = vector.load %arg5[%c0_20, %c0_21, %c0_22] : memref<1x1x1xf32, #tpu.memory_space<vmem>>, vector<1x1x1xf32>
      %38 = vector.shape_cast %37 : vector<1x1x1xf32> to vector<1x1xf32>
      %39 = vector.shape_cast %36 : vector<1x1xf32> to vector<1x1x1xf32>
      tpu.vector_store %arg5[%c0_20, %c0_21, %c0_22], %39 {strides = array<i32>} : memref<1x1x1xf32, #tpu.memory_space<vmem>>, vector<1x1x1xf32>,
    } else {
    }
    %c0 = arith.constant 0 : index
    %c0_1 = arith.constant 0 : index
    %c0_2 = arith.constant 0 : index
    %3 = vector.load %arg3[%c0, %c0_1, %c0_2] : memref<2x4x256xf32, #tpu.memory_space<vmem>>, vector<2x4x256xf32>
    %cst = arith.constant dense<0xFF800000> : vector<2x256xf32>
    %4 = vector.multi_reduction <maximumf>, %3, %cst [1] : vector<2x4x256xf32> to vector<2x256xf32>
    %5 = vector.shape_cast %4 : vector<2x256xf32> to vector<2x1x256xf32>
    %6 = vector.broadcast %5 : vector<2x1x256xf32> to vector<2x4x256xf32>
    %7 = arith.subf %3, %6 : vector<2x4x256xf32>
    %8 = math.exp %7 : vector<2x4x256xf32>
    %cst_3 = arith.constant dense<0.000000e+00> : vector<2x256xf32>
    %9 = vector.multi_reduction <add>, %8, %cst_3 [1] : vector<2x4x256xf32> to vector<2x256xf32>
    %10 = vector.shape_cast %9 : vector<2x256xf32> to vector<2x1x256xf32>
    %11 = math.log %10 : vector<2x1x256xf32>
    %12 = vector.broadcast %11 : vector<2x1x256xf32> to vector<2x4x256xf32>
    %13 = arith.subf %7, %12 : vector<2x4x256xf32>
    %14 = math.exp %13 : vector<2x4x256xf32>
    %cst_4 = arith.constant 9.99999997E-7 : f32
    %cst_5 = arith.constant 0.999998986 : f32
    %15 = vector.broadcast %cst_4 : f32 to vector<2x4x256xf32>
    %16 = arith.maximumf %15, %14 : vector<2x4x256xf32>
    %17 = vector.broadcast %cst_5 : f32 to vector<2x4x256xf32>
    %18 = arith.minimumf %17, %16 : vector<2x4x256xf32>
    %cst_6 = arith.constant 1.000000e+00 : f32
    %19 = vector.broadcast %cst_6 : f32 to vector<2x4x256xf32>
    %20 = arith.subf %19, %18 : vector<2x4x256xf32>
    %21 = arith.mulf %20, %20 : vector<2x4x256xf32>
    %22 = arith.mulf %13, %21 : vector<2x4x256xf32>
    %c0_7 = arith.constant 0 : index
    %c0_8 = arith.constant 0 : index
    %c0_9 = arith.constant 0 : index
    %23 = vector.load %arg4[%c0_7, %c0_8, %c0_9] : memref<2x4x256xf32, #tpu.memory_space<vmem>>, vector<2x4x256xf32>
    %24 = arith.mulf %23, %22 : vector<2x4x256xf32>
    %cst_10 = arith.constant dense<0.000000e+00> : vector<2x256xf32>
    %25 = vector.multi_reduction <add>, %24, %cst_10 [1] : vector<2x4x256xf32> to vector<2x256xf32>
    %26 = vector.shape_cast %25 : vector<2x256xf32> to vector<2x1x256xf32>
    %cst_11 = arith.constant dense<0.000000e+00> : vector<1x256xf32>
    %27 = vector.multi_reduction <add>, %26, %cst_11 [0] : vector<2x1x256xf32> to vector<1x256xf32>
    %c0_12 = arith.constant 0 : index
    %c0_13 = arith.constant 0 : index
    %c0_14 = arith.constant 0 : index
    %28 = vector.load %arg5[%c0_12, %c0_13, %c0_14] : memref<1x1x1xf32, #tpu.memory_space<vmem>>, vector<1x1x1xf32>
    %29 = vector.shape_cast %28 : vector<1x1x1xf32> to vector<1x1xf32>
    %cst_15 = arith.constant dense<0.000000e+00> : vector<1xf32>
    %30 = vector.multi_reduction <add>, %27, %cst_15 [1] : vector<1x256xf32> to vector<1xf32>
    %31 = vector.shape_cast %30 : vector<1xf32> to vector<1x1xf32>
    %32 = arith.addf %29, %31 : vector<1x1xf32>
    %c0_16 = arith.constant 0 : index
    %c0_17 = arith.constant 0 : index
    %c0_18 = arith.constant 0 : index
    %33 = vector.load %arg5[%c0_16, %c0_17, %c0_18] : memref<1x1x1xf32, #tpu.memory_space<vmem>>, vector<1x1x1xf32>
    %34 = vector.shape_cast %33 : vector<1x1x1xf32> to vector<1x1xf32>
    %35 = vector.shape_cast %32 : vector<1x1xf32> to vector<1x1x1xf32>
    tpu.vector_store %arg5[%c0_16, %c0_17, %c0_18], %35 {strides = array<i32>} : memref<1x1x1xf32, #tpu.memory_space<vmem>>, vector<1x1x1xf32>,
    return
  }
  func.func @transform_0(%arg0: i32, %arg1: i32, %arg2: i32) -> (i32, i32, i32) {
    %c1_i32 = arith.constant 1 : i32
    %0 = arith.muli %arg1, %c1_i32 : i32
    %1 = arith.addi %0, %arg2 : i32
    %c0_i32 = arith.constant 0 : i32
    %c0_i32_0 = arith.constant 0 : i32
    return %arg0, %c0_i32, %1 : i32, i32, i32
  }
  func.func @transform_1(%arg0: i32, %arg1: i32, %arg2: i32) -> (i32, i32, i32) {
    %c1_i32 = arith.constant 1 : i32
    %0 = arith.muli %arg1, %c1_i32 : i32
    %1 = arith.addi %0, %arg2 : i32
    %c0_i32 = arith.constant 0 : i32
    %c0_i32_0 = arith.constant 0 : i32
    return %arg0, %c0_i32, %1 : i32, i32, i32
  }
  func.func @transform_2(%arg0: i32, %arg1: i32, %arg2: i32) -> (i32, i32, i32) {
    %c0_i32 = arith.constant 0 : i32
    %c0_i32_0 = arith.constant 0 : i32
    return %arg0, %arg1, %c0_i32 : i32, i32, i32
  }
}

</mosaic_0001>

<bundles_post_ra>
// kernel: tpu_custom_call.1
= control target key start
LH: loop header
LB: loop body
LE: loop exit
PB: predicated region body
PF: predicated region fallthrough
CT: control target
= control target key end

     0   :  { %7 = vsyncpa [#allocation3], 0  ;;  %s417_s0 = inlined_call_operand.hbm [shape: f32[2,4,256], index: 0, kind: input, shape index: {}]   ;;  %s418_s1 = inlined_call_operand.hbm [shape: f32[2,4,256], index: 1, kind: input, shape index: {}]   ;;  %s419_s2 = inlined_call_operand.hbm [shape: f32[1,1,1], index: 2, kind: output, shape index: {}]  }
   0x1   :  { %8 = vsyncpa [#allocation6], 0 }
   0x2   :  { %9 = vsyncpa [#allocation4], 0  ;;  %s18_s11 = sshll.u32 %s417_s0, 4  ;;  %s369_s12 = smov [#allocation2]   ;;  %s19_s11 = int_to_ptr.hbm [resolvable:$true] %s18_s11 }
   0x3   :  { %s20_s13 = sshll.u32 %s369_s12, 4  ;;  %s35_s16 = sshll.u32 %s418_s1, 4  ;;  %s21_s13 = int_to_ptr.vmem [resolvable:$true] %s20_s13  ;;  %s36_s16 = int_to_ptr.hbm [resolvable:$true] %s35_s16 }
   0x4   :  { %s370_s17 = smov 128   ;;  %s371_s18 = smov 8  }
   0x5   :  { %26 = dma.hbm_to_vmem [thread:$0]  %s19_s11, 256, %s21_s13, [#allocation3], %s370_s17, %s370_s17, %s371_s18  }
   0x6   :  { %s372_s19 = smov [#allocation5]  }
   0x7   :  { %s37_s20 = sshll.u32 %s372_s19, 4  ;;  %s38_s20 = int_to_ptr.vmem [resolvable:$true] %s37_s20 }
   0x8   :  { %43 = dma.hbm_to_vmem [thread:$0]  %s36_s16, 256, %s38_s20, [#allocation6], %s370_s17, %s370_s17, %s371_s18  }
   0x9   :  { %363 = dma.done.wait [#allocation3], 256  }
   0xa   :  { %364 = vsyncadd [#allocation3], 4294967040 }
   0xb   :  { %365 = dma.done.wait [#allocation6], 256  }
   0xc   :  { %366 = vsyncadd [#allocation6], 4294967040  ;;  %v62_v0 = vld [vmem:[#allocation2] sm:$0xff]  ;;  %v63_v1 = vld [vmem:[#allocation2 + $0x8] sm:$0xff]  ;;  %vm77_vm0 = vcmask 1043456   ;;  %vm60_vm1 = vcmask 0  }
   0xd   :  { %66 = vst [vmem:[#allocation1] ss:$2 sm:$0xff] %v62_v0  ;;  %s374_s0 = smov [#allocation7]   ;;  %s258_s23 = sshll.u32 %s419_s2, 4  ;;  %s259_s23 = int_to_ptr.hbm [resolvable:$true] %s258_s23 }
   0xe   :  { %70 = vst [vmem:[#allocation1 + $0x10] ss:$2 sm:$0xff] %v63_v1  ;;  %s256_s1 = sshll.u32 %s374_s0, 4  ;;  %s257_s1 = int_to_ptr.vmem [resolvable:$true] %s256_s1 }
  0x14   :  { %v67_v2 = vld.sshfl [vmem:[#allocation1] sm:$0xff pattern:$0x75316420]  ;;  %v68_v3 = vld.sshfl [vmem:[#allocation1 + $0x8] sm:$0xff pattern:$0x75316420] }
  0x15   :  { %v71_v4 = vld.sshfl [vmem:[#allocation1 + $0x10] sm:$0xff pattern:$0x75316420]  ;;  %v72_v5 = vld.sshfl [vmem:[#allocation1 + $0x18] sm:$0xff pattern:$0x75316420] }
  0x16   :  { %v78_v6 = vsel %vm77_vm0, %v67_v2, -inf  ;;  %v85_v7 = vsel %vm77_vm0, %v68_v3, -inf  ;;  %v92_v8 = vsel %vm77_vm0, %v71_v4, -inf  ;;  %v99_v9 = vsel %vm77_vm0, %v72_v5, -inf }
  0x17   :  { %v79_v10 = vrot.slane %v78_v6, 4  ;;  %v86_v11 = vrot.slane %v85_v7, 4  ;;  %v93_v12 = vrot.slane %v92_v8, 4  ;;  %v100_v13 = vrot.slane %v99_v9, 4 }
  0x19   :  { %v80_v14 = vmax.f32 %v78_v6, %v79_v10  ;;  %v87_v15 = vmax.f32 %v85_v7, %v86_v11  ;;  %v94_v16 = vmax.f32 %v92_v8, %v93_v12  ;;  %v101_v17 = vmax.f32 %v99_v9, %v100_v13 }
  0x1b   :  { %v81_v18 = vrot.slane %v80_v14, 2  ;;  %v88_v19 = vrot.slane %v87_v15, 2  ;;  %v95_v20 = vrot.slane %v94_v16, 2  ;;  %v102_v21 = vrot.slane %v101_v17, 2 }
  0x1d   :  { %v82_v22 = vmax.f32 %v80_v14, %v81_v18  ;;  %v89_v23 = vmax.f32 %v87_v15, %v88_v19  ;;  %v96_v24 = vmax.f32 %v94_v16, %v95_v20  ;;  %v103_v25 = vmax.f32 %v101_v17, %v102_v21 }
  0x1f   :  { %v83_v26 = vrot.slane %v82_v22, 1  ;;  %v90_v27 = vrot.slane %v89_v23, 1  ;;  %v97_v28 = vrot.slane %v96_v24, 1  ;;  %v104_v29 = vrot.slane %v103_v25, 1 }
  0x21   :  { %v84_v30 = vmax.f32 %v82_v22, %v83_v26  ;;  %v91_v31 = vmax.f32 %v89_v23, %v90_v27  ;;  %v98_v32 = vmax.f32 %v96_v24, %v97_v28  ;;  %v105_v33 = vmax.f32 %v103_v25, %v104_v29 }
  0x23   :  { %v110_v34 = vrot.slane %v91_v31, 4  ;;  %v111_v35 = vrot.slane %v105_v33, 4 }
  0x25   :  { %v112_v36 = vsel %vm77_vm0, %v84_v30, %v110_v34  ;;  %v113_v37 = vsel %vm77_vm0, %v98_v32, %v111_v35 }
  0x26   :  { %v116_v38 = vsub.f32 %v62_v0, %v112_v36  ;;  %v117_v39 = vsub.f32 %v63_v1, %v113_v37  ;;  %v197_v37 = vld [vmem:[#allocation5] sm:$0xff] }
  0x28   :  { %v118_v40 = vmul.f32 1.442695, %v116_v38  ;;  %v120_v41 = vmul.f32 1.442695, %v117_v39 }
  0x2a   :  { %275 = vpow2.f32 %v118_v40 }
  0x2b   :  { %277 = vpow2.f32 %v120_v41  ;;  %v373_v41 = vmov 0.0  }
  0x2c   :  { %61 = vst.msk [vmem:[#allocation7] sm:$0x1] %vm60_vm1, %v373_v41 }
  0x30   :  { %v276_v42 = vpop.eup %275 }
  0x31   :  { %v278_v43 = vpop.eup %277  ;;  %124 = vst [vmem:[#allocation1] ss:$2 sm:$0xff] %v276_v42 }
  0x32   :  { %128 = vst [vmem:[#allocation1 + $0x10] ss:$2 sm:$0xff] %v278_v43 }
  0x38   :  { %v125_v44 = vld.sshfl [vmem:[#allocation1] sm:$0xff pattern:$0x75316420]  ;;  %v126_v45 = vld.sshfl [vmem:[#allocation1 + $0x8] sm:$0xff pattern:$0x75316420] }
  0x39   :  { %v129_v46 = vld.sshfl [vmem:[#allocation1 + $0x10] sm:$0xff pattern:$0x75316420]  ;;  %v130_v47 = vld.sshfl [vmem:[#allocation1 + $0x18] sm:$0xff pattern:$0x75316420] }
  0x3a   :  { %v135_v48 = vsel %vm77_vm0, %v125_v44, 0.0  ;;  %v142_v49 = vsel %vm77_vm0, %v126_v45, 0.0  ;;  %v149_v50 = vsel %vm77_vm0, %v129_v46, 0.0  ;;  %v156_v51 = vsel %vm77_vm0, %v130_v47, 0.0 }
  0x3b   :  { %v136_v52 = vrot.slane %v135_v48, 4  ;;  %v143_v53 = vrot.slane %v142_v49, 4  ;;  %v150_v54 = vrot.slane %v149_v50, 4  ;;  %v157_v55 = vrot.slane %v156_v51, 4 }
  0x3d   :  { %v137_v56 = vadd.f32 %v136_v52, %v135_v48  ;;  %v144_v57 = vadd.f32 %v143_v53, %v142_v49  ;;  %v151_v58 = vadd.f32 %v150_v54, %v149_v50  ;;  %v158_v59 = vadd.f32 %v157_v55, %v156_v51 }
  0x3f   :  { %v138_v60 = vrot.slane %v137_v56, 2  ;;  %v145_v61 = vrot.slane %v144_v57, 2  ;;  %v152_v62 = vrot.slane %v151_v58, 2  ;;  %v159_v63 = vrot.slane %v158_v59, 2 }
  0x41   :  { %v139_v0 = vadd.f32 %v138_v60, %v137_v56  ;;  %v146_v1 = vadd.f32 %v145_v61, %v144_v57  ;;  %v153_v2 = vadd.f32 %v152_v62, %v151_v58  ;;  %v160_v3 = vadd.f32 %v159_v63, %v158_v59 }
  0x43   :  { %v140_v4 = vrot.slane %v139_v0, 1  ;;  %v147_v5 = vrot.slane %v146_v1, 1  ;;  %v154_v6 = vrot.slane %v153_v2, 1  ;;  %v161_v7 = vrot.slane %v160_v3, 1 }
  0x45   :  { %v141_v8 = vadd.f32 %v140_v4, %v139_v0  ;;  %v148_v9 = vadd.f32 %v147_v5, %v146_v1  ;;  %v155_v10 = vadd.f32 %v154_v6, %v153_v2  ;;  %v162_v11 = vadd.f32 %v161_v7, %v160_v3 }
  0x47   :  { %279 = vlog2.f32 %v141_v8 }
  0x48   :  { %281 = vlog2.f32 %v148_v9 }
  0x49   :  { %283 = vlog2.f32 %v155_v10 }
  0x4a   :  { %285 = vlog2.f32 %v162_v11 }
  0x4d   :  { %v280_v12 = vpop.eup %279 }
  0x4e   :  { %v282_v13 = vpop.eup %281  ;;  %v164_v15 = vmul.f32 0.6931472, %v280_v12 }
  0x4f   :  { %v284_v14 = vpop.eup %283  ;;  %v166_v16 = vmul.f32 0.6931472, %v282_v13 }
  0x50   :  { %v286_v17 = vpop.eup %285  ;;  %v168_v18 = vmul.f32 0.6931472, %v284_v14 }
  0x51   :  { %v170_v19 = vmul.f32 0.6931472, %v286_v17  ;;  %v175_v20 = vrot.slane %v166_v16, 4  ;;  %v244_v16 = vld [vmem:[#allocation7] sm:$0x1] }
  0x53   :  { %v176_v21 = vrot.slane %v170_v19, 4  ;;  %v177_v22 = vsel %vm77_vm0, %v164_v15, %v175_v20 }
  0x54   :  { %v181_v23 = vsub.f32 %v116_v38, %v177_v22 }
  0x55   :  { %v178_v24 = vsel %vm77_vm0, %v168_v18, %v176_v21 }
  0x56   :  { %v182_v25 = vsub.f32 %v117_v39, %v178_v24  ;;  %v183_v26 = vmul.f32 1.442695, %v181_v23  ;;  %v198_v39 = vld [vmem:[#allocation5 + $0x8] sm:$0xff] }
  0x58   :  { %287 = vpow2.f32 %v183_v26  ;;  %v185_v27 = vmul.f32 1.442695, %v182_v25 }
  0x5a   :  { %289 = vpow2.f32 %v185_v27 }
  0x5e   :  { %v288_v28 = vpop.eup %287 }
  0x5f   :  { %v187_v29 = vmax.f32 %v288_v28, 1e-06 }
  0x60   :  { %v290_v30 = vpop.eup %289 }
  0x61   :  { %v188_v31 = vmax.f32 %v290_v30, 1e-06  ;;  %v189_v32 = vmin.f32 %v187_v29, 0.999999 }
  0x63   :  { %v190_v33 = vmin.f32 %v188_v31, 0.999999  ;;  %v191_v34 = vsub.f32 1.0, %v189_v32 }
  0x65   :  { %v192_v35 = vsub.f32 1.0, %v190_v33  ;;  %v193_v36 = vmul.f32 %v191_v34, %v191_v34 }
  0x67   :  { %v194_v40 = vmul.f32 %v192_v35, %v192_v35  ;;  %v195_v38 = vmul.f32 %v193_v36, %v181_v23 }
  0x69   :  { %v196_v42 = vmul.f32 %v194_v40, %v182_v25  ;;  %v199_v43 = vmul.f32 %v197_v37, %v195_v38 }
  0x6b   :  { %v200_v44 = vmul.f32 %v198_v39, %v196_v42  ;;  %203 = vst [vmem:[#allocation1] ss:$2 sm:$0xff] %v199_v43 }
  0x6d   :  { %207 = vst [vmem:[#allocation1 + $0x10] ss:$2 sm:$0xff] %v200_v44 }
  0x72   :  { %v204_v45 = vld.sshfl [vmem:[#allocation1] sm:$0xff pattern:$0x75316420]  ;;  %v205_v46 = vld.sshfl [vmem:[#allocation1 + $0x8] sm:$0xff pattern:$0x75316420] }
  0x73   :  { %v214_v47 = vsel %vm77_vm0, %v204_v45, 0.0  ;;  %v221_v48 = vsel %vm77_vm0, %v205_v46, 0.0 }
  0x74   :  { %v208_v49 = vld.sshfl [vmem:[#allocation1 + $0x10] sm:$0xff pattern:$0x75316420]  ;;  %v209_v50 = vld.sshfl [vmem:[#allocation1 + $0x18] sm:$0xff pattern:$0x75316420] }
  0x75   :  { %v215_v51 = vrot.slane %v214_v47, 4  ;;  %v222_v52 = vrot.slane %v221_v48, 4  ;;  %v228_v53 = vsel %vm77_vm0, %v208_v49, 0.0  ;;  %v235_v54 = vsel %vm77_vm0, %v209_v50, 0.0 }
  0x76   :  { %v229_v55 = vrot.slane %v228_v53, 4  ;;  %v236_v56 = vrot.slane %v235_v54, 4 }
  0x77   :  { %v216_v57 = vadd.f32 %v215_v51, %v214_v47  ;;  %v223_v58 = vadd.f32 %v222_v52, %v221_v48 }
  0x78   :  { %v230_v59 = vadd.f32 %v229_v55, %v228_v53  ;;  %v237_v60 = vadd.f32 %v236_v56, %v235_v54 }
  0x79   :  { %v217_v61 = vrot.slane %v216_v57, 2  ;;  %v224_v62 = vrot.slane %v223_v58, 2 }
  0x7a   :  { %v231_v63 = vrot.slane %v230_v59, 2  ;;  %v238_v0 = vrot.slane %v237_v60, 2 }
  0x7b   :  { %v218_v1 = vadd.f32 %v217_v61, %v216_v57  ;;  %v225_v2 = vadd.f32 %v224_v62, %v223_v58 }
  0x7c   :  { %v232_v3 = vadd.f32 %v231_v63, %v230_v59  ;;  %v239_v4 = vadd.f32 %v238_v0, %v237_v60 }
  0x7d   :  { %v219_v5 = vrot.slane %v218_v1, 1  ;;  %v226_v6 = vrot.slane %v225_v2, 1 }
  0x7e   :  { %v233_v7 = vrot.slane %v232_v3, 1  ;;  %v240_v8 = vrot.slane %v239_v4, 1 }
  0x7f   :  { %v220_v9 = vadd.f32 %v219_v5, %v218_v1  ;;  %v227_v10 = vadd.f32 %v226_v6, %v225_v2 }
  0x80   :  { %v234_v11 = vadd.f32 %v233_v7, %v232_v3  ;;  %v241_v12 = vadd.f32 %v240_v8, %v239_v4 }
  0x82   :  { %v242_v13 = vadd.f32 %v234_v11, %v220_v9  ;;  %v243_v14 = vadd.f32 %v241_v12, %v227_v10 }
  0x84   :  { %v245_v15 = vadd.f32 %v243_v14, %v242_v13 }
  0x86   :  { %246 = vadd.xlane.f32.xlu0 %v245_v15 }
  0xf9   :  { %v247_v17 = vpop.xlane.xlu0 %246 }
  0xfa   :  { %v248_v18 = vadd.f32 %v247_v17, %v244_v16 }
  0xfc   :  { %250 = vst.msk [vmem:[#allocation7] sm:$0x1] %vm60_vm1, %v248_v18 }
  0xfd   :  { %261 = dma.vmem_to_hbm [thread:$0]  %s257_s1, 16, %s259_s23, [#allocation4]  }
  0xfe   :  { %367 = dma.done.wait [#allocation4], 16  }
  0xff   :  { %368 = vsyncadd [#allocation4], 4294967280 }
 0x100   :  { %266 = vsyncpa [#allocation3], 1 }
 0x101   :  { %267 = vsyncpa [#allocation6], 1 }
 0x102   :  { %268 = vsyncpa [#allocation4], 1 }

</bundles_post_ra>
